<compile_context>
chip_gen: v5e
topology: v5e:2x2
jax: 0.10.0
libtpu: 0.0.40
codegen_flags: <defaults>
</compile_context>

<pallas_src>
import jax
import jax.numpy as jnp
from jax.experimental import pallas as pl
from jax.experimental.pallas import tpu as pltpu

_MIB = 1024 * 1024
_MAX_BLOCK_ROWS = 2048  # caps the lane-padded (block_rows, 1) weight column to ~1 MiB/buffer


def _vmem_capacity_bytes() -> int:
    """Physical VMEM on this chip; conservative 64 MiB (v7x) fallback."""
    try:
        info = pltpu.get_tpu_info()
        cap = int(getattr(info, "vmem_capacity_bytes", 0))
        if cap > 0:
            return cap
    except Exception:
        pass
    return 64 * _MIB


def _rescale_kernel(x_ref, w_ref, o_ref):
    # x_ref / o_ref: (block_rows, block_cols) tiles; w_ref: (block_rows, 1) f32.
    # Multiply in f32 (matches torch promotion of an f32 weight); the kernel is
    # HBM-bound, so the upcast never shows up in wall clock.
    o_ref[...] = (x_ref[...].astype(jnp.float32) * w_ref[...]).astype(o_ref.dtype)


def rescale(x: jax.Array, weight: jax.Array) -> jax.Array:
    """Per-channel rescale. x: (N, C, H, W), weight: (C, 1, 1) or (C,)."""
    n, c, h, w = x.shape
    rows = n * c
    cols = h * w
    itemsize = x.dtype.itemsize
    # Sublane packing: 8 rows for f32, 16 for bf16/f16, 32 for int8/fp8.
    pack = max(8, 32 // itemsize)

    # Generation-aware budgets.
    vmem_cap = _vmem_capacity_bytes()
    tile_budget = min(16 * _MIB, max(2 * _MIB, vmem_cap // 8))

    # Lane-dense 2D view: one row per (n, c), full spatial extent in lanes.
    x2d = x.reshape(rows, cols)

    # Per-row f32 weight column: row r = n_idx * C + c_idx -> weight[c_idx].
    w_flat = weight.reshape(c).astype(jnp.float32)
    w_rows = jnp.broadcast_to(w_flat[None, :], (n, c)).reshape(rows, 1)

    # --- Column tiling -------------------------------------------------------
    cols_p = cols
    row_bytes = cols * itemsize
    if row_bytes > tile_budget:
        # A single row exceeds the budget: split on 128-lane boundaries, padding
        # the lane dim first if needed so the split stays legal and the
        # double-buffered footprint stays bounded.
        if cols % 128 != 0:
            cols_p = ((cols + 127) // 128) * 128
            x2d = jnp.pad(x2d, ((0, 0), (0, cols_p - cols)))
        block_cols = max(128, (tile_budget // itemsize) // 128 * 128)
        block_cols = min(block_cols, cols_p)
    else:
        block_cols = cols  # full row: always BlockSpec-legal, lane-dense stores

    # --- Row tiling ----------------------------------------------------------
    if rows <= pack:
        block_rows = rows  # full leading dim: legal for any row count / dtype
    else:
        br = tile_budget // max(1, block_cols * itemsize)
        br = min(br, _MAX_BLOCK_ROWS, rows)
        block_rows = max(pack, (br // pack) * pack)  # multiple of pack, <= rows

    # --- Megacore (v7x): ensure a "parallel" axis has >= 2 blocks when possible
    if (pl.cdiv(rows, block_rows) * pl.cdiv(cols_p, block_cols)) < 2 and rows >= 2 * pack:
        half = (((rows + 1) // 2) + pack - 1) // pack * pack
        block_rows = min(block_rows, half)

    grid = (pl.cdiv(rows, block_rows), pl.cdiv(cols_p, block_cols))

    # Scoped VMEM: 2x(in) + 2x(out) tiles + weight columns + headroom, capped
    # at 3/4 of physical VMEM (stays safe on v7x's 64 MiB).
    tile_bytes = block_rows * block_cols * itemsize
    vmem_limit = int(min(vmem_cap * 3 // 4, max(32 * _MIB, 4 * tile_bytes + 8 * _MIB)))

    cost = pl.CostEstimate(
        flops=rows * cols,
        bytes_accessed=2 * rows * cols * itemsize + rows * 4,
        transcendentals=0,
    )

    out2d = pl.pallas_call(
        _rescale_kernel,
        out_shape=jax.ShapeDtypeStruct((rows, cols_p), x.dtype),
        grid_spec=pl.GridSpec(
            grid=grid,
            in_specs=[
                pl.BlockSpec((block_rows, block_cols), lambda i, j: (i, j)),  # x tile
                pl.BlockSpec((block_rows, 1), lambda i, j: (i, 0)),           # weight col
            ],
            out_specs=pl.BlockSpec((block_rows, block_cols), lambda i, j: (i, j)),
        ),
        compiler_params=pltpu.CompilerParams(
            dimension_semantics=("parallel", "parallel"),
            vmem_limit_bytes=vmem_limit,
        ),
        cost_estimate=cost,
    )(x2d, w_rows)

    if cols_p != cols:
        out2d = out2d[:, :cols]
    return out2d.reshape(n, c, h, w)


if __name__ == "__main__":
    key = jax.random.PRNGKey(0)
    kx, _ = jax.random.split(key)

    N, C, H, W = 2, 4, 16, 16
    x = jax.random.normal(kx, (N, C, H, W), dtype=jnp.float32)

    # PyTorch __init__ uses torch.ones(num_channels, 1, 1); use a deterministic
    # non-trivial per-channel scale here so broadcasting is actually exercised.
    weight = (1.0 + 0.5 * jnp.arange(C, dtype=jnp.float32)).reshape(C, 1, 1)

    out = rescale(x, weight)
    out = jax.block_until_ready(out)

    ref = weight.reshape(1, C, 1, 1) * x
    assert out.shape == x.shape and out.dtype == x.dtype
    assert jnp.allclose(out, ref, atol=1e-6, rtol=1e-6)
    print("KERNEL_OK")
</pallas_src>

<mosaic_0001>
module attributes {stable_mosaic.version = 11 : i64} {
  func.func @_rescale_kernel(%arg0: i32, %arg1: i32, %arg2: memref<8x256xf32, #tpu.memory_space<vmem>>, %arg3: memref<8x1xf32, #tpu.memory_space<vmem>>, %arg4: memref<8x256xf32, #tpu.memory_space<vmem>>) attributes {dimension_semantics = [#tpu.dimension_semantics<parallel>, #tpu.dimension_semantics<parallel>], iteration_bounds = array<i64: 1, 1>, scalar_prefetch = 0 : i64, scratch_operands = 0 : i64, tpu.core_type = #tpu.core_type<tc>, window_params = [{transform_indices = @transform_0, window_bounds = array<i64: 8, 256>}, {transform_indices = @transform_1, window_bounds = array<i64: 8, 1>}, {transform_indices = @transform_2, window_bounds = array<i64: 8, 256>}]} {
    %c0 = arith.constant 0 : index
    %c0_0 = arith.constant 0 : index
    %0 = vector.load %arg2[%c0, %c0_0] : memref<8x256xf32, #tpu.memory_space<vmem>>, vector<8x256xf32>
    %c0_1 = arith.constant 0 : index
    %c0_2 = arith.constant 0 : index
    %1 = vector.load %arg3[%c0_1, %c0_2] : memref<8x1xf32, #tpu.memory_space<vmem>>, vector<8x1xf32>
    %2 = vector.broadcast %1 : vector<8x1xf32> to vector<8x256xf32>
    %3 = arith.mulf %0, %2 : vector<8x256xf32>
    %c0_3 = arith.constant 0 : index
    %c0_4 = arith.constant 0 : index
    %4 = vector.load %arg4[%c0_3, %c0_4] : memref<8x256xf32, #tpu.memory_space<vmem>>, vector<8x256xf32>
    tpu.vector_store %arg4[%c0_3, %c0_4], %3 {strides = array<i32>} : memref<8x256xf32, #tpu.memory_space<vmem>>, vector<8x256xf32>,
    return
  }
  func.func @transform_0(%arg0: i32, %arg1: i32) -> (i32, i32) {
    %c0_i32 = arith.constant 0 : i32
    return %arg0, %arg1 : i32, i32
  }
  func.func @transform_1(%arg0: i32, %arg1: i32) -> (i32, i32) {
    %c0_i32 = arith.constant 0 : i32
    %c0_i32_0 = arith.constant 0 : i32
    return %arg0, %c0_i32 : i32, i32
  }
  func.func @transform_2(%arg0: i32, %arg1: i32) -> (i32, i32) {
    %c0_i32 = arith.constant 0 : i32
    return %arg0, %arg1 : i32, i32
  }
}

</mosaic_0001>

<bundles_post_ra>
// kernel: tpu_custom_call.1
= control target key start
LH: loop header
LB: loop body
LE: loop exit
PB: predicated region body
PF: predicated region fallthrough
CT: control target
= control target key end

     0   :  { %7 = vsyncpa [#allocation3], 0  ;;  %s138_s0 = inlined_call_operand.hbm [shape: f32[8,256], index: 0, kind: input, shape index: {}]   ;;  %s139_s1 = inlined_call_operand.vmem [shape: f32[8,1], index: 1, kind: input, shape index: {}]   ;;  %s140_s2 = inlined_call_operand.hbm [shape: f32[8,256], index: 2, kind: output, shape index: {}]  }
   0x1   :  { %8 = vsyncpa [#allocation4], 0  ;;  %s14_s11 = sshll.u32 %s138_s0, 4  ;;  %s111_s12 = smov [#allocation2]   ;;  %s15_s11 = int_to_ptr.hbm [resolvable:$true] %s14_s11 }
   0x2   :  { %s16_s13 = sshll.u32 %s111_s12, 4  ;;  %s17_s13 = int_to_ptr.vmem [resolvable:$true] %s16_s13 }
   0x3   :  { %19 = dma.hbm_to_vmem [thread:$0]  %s15_s11, 256, %s17_s13, [#allocation3]  }
   0x4   :  { %107 = dma.done.wait [#allocation3], 256  }
   0x5   :  { %108 = vsyncadd [#allocation3], 4294967040  ;;  %v112_v0 = vmov 0   ;;  %v28_v1 = vld [vmem:[%s139_s1] sm:$0xff]  ;;  %v27_v3 = vld [vmem:[#allocation2 + $0x8] sm:$0xff]  ;;  %s113_s16 = smov [#allocation5]  }
   0x6   :  { %58 = vset.pattern.permute.xlu0 %v112_v0  ;;  %v26_v2 = vld [vmem:[#allocation2] sm:$0xff]  ;;  %s43_s17 = sshll.u32 %s113_s16, 4  ;;  %s45_s19 = sshll.u32 %s140_s2, 4  ;;  %s44_s17 = int_to_ptr.vmem [resolvable:$true] %s43_s17  ;;  %s46_s19 = int_to_ptr.hbm [resolvable:$true] %s45_s19 }
   0x7   :  { %31 = vperm.xlu0 %58, %v28_v1  }
  0x79   :  { %v32_v4 = vpop.permute.xlu0 %31 }
  0x7a   :  { %v34_v5 = vmul.f32 %v32_v4, %v26_v2  ;;  %v35_v6 = vmul.f32 %v32_v4, %v27_v3 }
  0x7c   :  { %36 = vst [vmem:[#allocation5] sm:$0xff] %v34_v5 }
  0x7d   :  { %37 = vst [vmem:[#allocation5 + $0x8] sm:$0xff] %v35_v6 }
  0x7e   :  { %48 = dma.vmem_to_hbm [thread:$0]  %s44_s17, 256, %s46_s19, [#allocation4]  }
  0x7f   :  { %109 = dma.done.wait [#allocation4], 256  }
  0x80   :  { %110 = vsyncadd [#allocation4], 4294967040 }
  0x81   :  { %53 = vsyncpa [#allocation3], 1 }
  0x82   :  { %54 = vsyncpa [#allocation4], 1 }

</bundles_post_ra>
